<compile_context>
chip_gen: v7x
topology: tpu7x:2x2x1
jax: 0.10.0
libtpu: 0.0.40
codegen_flags: <defaults>
</compile_context>

<pallas_src>
import jax
import jax.numpy as jnp
from jax import lax
from jax.experimental import pallas as pl
from jax.experimental.pallas import tpu as pltpu


# Explicit scoped-VMEM budget: fits v7x's 64 MiB physical VMEM with headroom
# and is far under v5e/v6e's 128 MiB; working sets below are sized well under.
_VMEM_LIMIT = 32 * 1024 * 1024


def _round_up(x: int, m: int) -> int:
    return ((x + m - 1) // m) * m


def _round_down(x: int, m: int) -> int:
    return (x // m) * m


# ---------------------------------------------------------------------------
# Kernel 1: post-MP MLP (single Linear, bias=True), output in (Dout, N) layout
# ---------------------------------------------------------------------------
def _linear_t_kernel(x_ref, wt_ref, bt_ref, o_ref):
    # (Dout, tr) = (Dout, Din) @ (tr, Din)^T : the node-tile transpose is fused
    # into the MXU matmul, so h is produced directly in (D, N) layout with a
    # lane-dense (tr >= 128 lanes) store.
    o_ref[...] = (
        jnp.dot(wt_ref[...], x_ref[...].T, preferred_element_type=jnp.float32)
        + bt_ref[...]
    ).astype(o_ref.dtype)


def linear_t_pallas(x, w, b, *, tile_rows=None):
    """h^T = (x @ w + b)^T stored in (Dout, Np) layout.

    Np = N rounded up to the (128-aligned) row tile.  Padded columns hold `b`
    and are never selected by the edge kernel (all edge indices are < N).
    """
    N, Din = x.shape
    Dout = w.shape[1]
    if tile_rows is None:
        # ~8 MiB for the double-buffered x tile + transposed output tile.
        tile_rows = (8 * 1024 * 1024) // (2 * 4 * (Din + Dout))
    tr = max(128, min(2048, _round_down(int(tile_rows), 128)))
    tr = min(tr, _round_up(N, 128))
    Np = _round_up(N, tr)
    if Np != N:
        x = jnp.pad(x, ((0, Np - N), (0, 0)))
    wt = w.T                            # (Dout, Din): tiny, resident weight
    bt = jnp.reshape(b, (Dout, 1))      # bias as a column, broadcast over nodes
    return pl.pallas_call(
        _linear_t_kernel,
        out_shape=jax.ShapeDtypeStruct((Dout, Np), x.dtype),
        grid_spec=pl.GridSpec(
            grid=(Np // tr,),
            in_specs=[
                pl.BlockSpec((tr, Din), lambda i: (i, 0)),
                pl.BlockSpec((Dout, Din), lambda i: (0, 0)),   # resident W^T
                pl.BlockSpec((Dout, 1), lambda i: (0, 0)),     # resident bias
            ],
            out_specs=pl.BlockSpec((Dout, tr), lambda i: (0, i)),
        ),
        compiler_params=pltpu.CompilerParams(
            dimension_semantics=("parallel",),
            vmem_limit_bytes=_VMEM_LIMIT,
        ),
    )(x, wt, bt)


# ---------------------------------------------------------------------------
# Kernel 2 (fused): gather edge endpoints from h^T via a single concatenated
# one-hot MXU matmul per node chunk, accumulate in VMEM, then edge dot.
# ---------------------------------------------------------------------------
def _edge_gather_dot_kernel(idx_ref, ht_ref, o_ref, g_acc):
    """Grid = (edge_tiles, node_chunks); node axis is the reduction axis.

    idx_ref: (1, 2*te) lane-dense [src | dst] indices for this edge tile.
    ht_ref : (D, nc) chunk of h^T.
    g_acc  : (D, 2*te) f32 scratch accumulating gathered endpoint features.
    """
    k = pl.program_id(1)

    @pl.when(k == 0)
    def _init():
        g_acc[...] = jnp.zeros_like(g_acc)

    ht = ht_ref[...]                           # (D, nc)
    nc = ht.shape[1]
    te = idx_ref.shape[1] // 2

    # Single concatenated one-hot for [src | dst] -> one MXU push per step
    # (halves matmul count and one-hot live ranges; VPU compare/select is the
    # saturating unit here).  Indices outside this chunk never match.
    idx = idx_ref[...] - k * nc                # chunk-local node ids, (1, 2*te)
    node_iota = lax.broadcasted_iota(jnp.int32, (nc, 2 * te), 0)
    onehot = jnp.where(node_iota == idx, 1.0, 0.0).astype(ht.dtype)
    g_acc[...] += jnp.dot(ht, onehot, preferred_element_type=jnp.float32)

    @pl.when(k == pl.num_programs(1) - 1)
    def _finalize():
        g = g_acc[...]
        # Cross-sublane (feature) reduce runs on the XLU, off the VPU critical
        # path; result is a lane-dense (1, te) row -> unmasked full-width vst.
        o_ref[...] = jnp.sum(
            g[:, :te] * g[:, te:], axis=0, keepdims=True
        ).astype(o_ref.dtype)


def edge_dot_pallas(h_t, src_idx, dst_idx, *, tile_edges=None, node_chunk=1024):
    """pred[e] = <h[:, src[e]], h[:, dst[e]]> for h_t of shape (D, Np).

    h^T is streamed through VMEM in (D, node_chunk) column chunks and the
    per-edge-tile gathered features are accumulated in VMEM scratch, so VMEM
    use is bounded independently of N and no (E, D) gathered intermediates
    ever touch HBM.
    """
    D, Np = h_t.shape
    if Np % 128:                               # only when called standalone
        h_t = jnp.pad(h_t, ((0, 0), (0, 128 - Np % 128)))
        Np = h_t.shape[1]
    E = int(src_idx.shape[0])

    # Node chunk: a multiple of 128 that divides Np (capped so the per-tile
    # one-hot and the h^T chunk stay small even for wide features).
    nc = min(Np, max(128, _round_down(int(node_chunk), 128)))
    while Np % nc:
        nc -= 128

    # Edge tile: lane-dense multiple of 128, sized so the (nc, 2*te) one-hot
    # stays ~<= 4 MiB -> small graphs take bigger tiles to amortize the
    # ~0.35us/step grid overhead, large graphs stay within VMEM.
    if tile_edges is None:
        tile_edges = (4 * 1024 * 1024) // (nc * 2 * 4)
    te = max(128, min(1024, _round_down(int(tile_edges), 128)))
    te = min(te, _round_up(max(E, 1), 128))
    Ep = _round_up(max(E, 1), te)
    n_et = Ep // te

    pad = Ep - E
    src = jnp.pad(src_idx.astype(jnp.int32), (0, pad))
    dst = jnp.pad(dst_idx.astype(jnp.int32), (0, pad))
    # Per-tile [src | dst] packed into one lane-dense row: tile e owns columns
    # [e*2*te, (e+1)*2*te).  Pad lanes index node 0 and are sliced off below.
    idx = jnp.stack([src.reshape(n_et, te), dst.reshape(n_et, te)], axis=1
                    ).reshape(1, n_et * 2 * te)

    out = pl.pallas_call(
        _edge_gather_dot_kernel,
        out_shape=jax.ShapeDtypeStruct((1, Ep), jnp.float32),
        grid_spec=pltpu.PrefetchScalarGridSpec(
            num_scalar_prefetch=0,
            grid=(n_et, Np // nc),             # reduction (node) axis last
            in_specs=[
                pl.BlockSpec((1, 2 * te), lambda e, k: (0, e)),
                pl.BlockSpec((D, nc), lambda e, k: (0, k)),
            ],
            out_specs=pl.BlockSpec((1, te), lambda e, k: (0, e)),
            scratch_shapes=[pltpu.VMEM((D, 2 * te), jnp.float32)],
        ),
        compiler_params=pltpu.CompilerParams(
            dimension_semantics=("parallel", "arbitrary"),
            vmem_limit_bytes=_VMEM_LIMIT,
        ),
    )(idx, h_t)
    return out[0, :E]


# ---------------------------------------------------------------------------
# GNNEdgeHead (JAX wrapper; index bookkeeping is glue, compute in kernels)
# ---------------------------------------------------------------------------
class GNNEdgeHeadPallas:
    """GraphGym GNNEdgeHead, cfg.model.edge_decoding='dot',
    cfg.gnn.layers_post_mp=1 (a single Linear(dim_in, dim_in, bias=True))."""

    def __init__(self, dim_in: int, dim_out: int, key):
        # TODO(synk): only the default 'dot' decoding is implemented; the
        # 'concat'/'edgeconcat'/'cosine_similarity' config branches are not.
        assert dim_out == 1  # binary 'dot' edge decoding requires dim_out == 1
        kw, kb = jax.random.split(key)
        scale = 1.0 / (dim_in ** 0.5)
        self.W = jax.random.uniform(kw, (dim_in, dim_in), jnp.float32, -scale, scale)
        self.b = jax.random.uniform(kb, (1, dim_in), jnp.float32, -scale, scale)

    def __call__(self, batch):
        # batch = self.layer_post_mp(batch): post-MP Linear on node_feature,
        # produced directly in (D, N) layout by the kernel (no h.T round trip).
        h_t = linear_t_pallas(batch["node_feature"], self.W, self.b)

        eli = batch["edge_label_index"]
        # _apply_index + decode_module('dot'): pred[e] = <h[src[e]], h[dst[e]]>
        # (For E >> N a Gram-matrix path G = h @ h^T then gather would win;
        #  not needed at these scales.)
        pred = edge_dot_pallas(h_t, eli[0], eli[1])

        label = batch["edge_label"]

        # copy.deepcopy([t.detach().clone() ...]) is unnecessary for jax.Arrays
        # (immutable); a shallow list copy preserves the semantics.
        node_states = list(batch["node_states"])
        return pred, label, node_states


if __name__ == "__main__":
    key = jax.random.PRNGKey(0)
    k_feat, k_idx, k_lbl, k_head = jax.random.split(key, 4)

    N, D, E = 64, 32, 16  # nodes, dim_in, labeled edges

    node_feature = jax.random.normal(k_feat, (N, D), jnp.float32)
    edge_label_index = jax.random.randint(k_idx, (2, E), 0, N, jnp.int32)
    edge_label = jax.random.randint(k_lbl, (E,), 0, 2, jnp.int32)
    node_states = [node_feature]  # a single stashed node-state tensor

    batch = {
        "node_feature": node_feature,
        "edge_label_index": edge_label_index,
        "edge_label": edge_label,
        "node_states": node_states,
    }

    head = GNNEdgeHeadPallas(dim_in=D, dim_out=1, key=k_head)
    pred, label, states = head(batch)
    jax.block_until_ready((pred, label, states))

    # Reference in plain JAX (HIGHEST precision matmul); tolerance allows for
    # MXU pass-precision differences between the kernel and the XLA reference.
    h_ref = jnp.dot(node_feature, head.W, precision=lax.Precision.HIGHEST) + head.b
    pred_ref = jnp.sum(
        h_ref[edge_label_index[0]] * h_ref[edge_label_index[1]], axis=-1
    )
    assert pred.shape == (E,)
    assert jnp.allclose(pred, pred_ref, atol=2e-2, rtol=2e-2)

    # Also exercise the multi-chunk reduction path: several node chunks per
    # edge tile and several edge tiles (grid = (2, 3)).
    N2, E2 = 300, 200
    k2f, k2i = jax.random.split(jax.random.PRNGKey(1))
    x2 = jax.random.normal(k2f, (N2, D), jnp.float32)
    eli2 = jax.random.randint(k2i, (2, E2), 0, N2, jnp.int32)
    h2_t = linear_t_pallas(x2, head.W, head.b)            # (D, 384) padded
    pred2 = edge_dot_pallas(h2_t, eli2[0], eli2[1], tile_edges=128, node_chunk=128)
    jax.block_until_ready(pred2)
    h2_ref = jnp.dot(x2, head.W, precision=lax.Precision.HIGHEST) + head.b
    pred2_ref = jnp.sum(h2_ref[eli2[0]] * h2_ref[eli2[1]], axis=-1)
    assert pred2.shape == (E2,)
    assert jnp.allclose(pred2, pred2_ref, atol=2e-2, rtol=2e-2)

    print("KERNEL_OK")
</pallas_src>

<mosaic_0001>
module attributes {stable_mosaic.version = 11 : i64} {
  func.func @_linear_t_kernel(%arg0: i32, %arg1: memref<128x32xf32, #tpu.memory_space<vmem>>, %arg2: memref<32x32xf32, #tpu.memory_space<vmem>>, %arg3: memref<32x1xf32, #tpu.memory_space<vmem>>, %arg4: memref<32x128xf32, #tpu.memory_space<vmem>>) attributes {dimension_semantics = [#tpu.dimension_semantics<parallel>], iteration_bounds = array<i64: 1>, scalar_prefetch = 0 : i64, scratch_operands = 0 : i64, tpu.core_type = #tpu.core_type<tc>, window_params = [{transform_indices = @transform_0, window_bounds = array<i64: 128, 32>}, {pipeline_mode = #tpu.pipeline_mode<synchronous>, transform_indices = @transform_1, window_bounds = array<i64: 32, 32>}, {pipeline_mode = #tpu.pipeline_mode<synchronous>, transform_indices = @transform_2, window_bounds = array<i64: 32, 1>}, {transform_indices = @transform_3, window_bounds = array<i64: 32, 128>}]} {
    %c0 = arith.constant 0 : index
    %c0_0 = arith.constant 0 : index
    %0 = vector.load %arg2[%c0, %c0_0] : memref<32x32xf32, #tpu.memory_space<vmem>>, vector<32x32xf32>
    %c0_1 = arith.constant 0 : index
    %c0_2 = arith.constant 0 : index
    %1 = vector.load %arg1[%c0_1, %c0_2] : memref<128x32xf32, #tpu.memory_space<vmem>>, vector<128x32xf32>
    %2 = tpu.transpose %1, [1, 0] : vector<128x32xf32> -> vector<32x128xf32>
    %cst = arith.constant dense<0.000000e+00> : vector<32x128xf32>
    %3 = tpu.matmul %0, %2, %cst {dimension_numbers = #tpu.dot_dimension_numbers<[1], [0], [0], [1], [0, 0, 1, 1], [], []>} : vector<32x32xf32>, vector<32x128xf32>, vector<32x128xf32> -> vector<32x128xf32>
    %c0_3 = arith.constant 0 : index
    %c0_4 = arith.constant 0 : index
    %4 = vector.load %arg3[%c0_3, %c0_4] : memref<32x1xf32, #tpu.memory_space<vmem>>, vector<32x1xf32>
    %5 = vector.broadcast %4 : vector<32x1xf32> to vector<32x128xf32>
    %6 = arith.addf %3, %5 : vector<32x128xf32>
    %c0_5 = arith.constant 0 : index
    %c0_6 = arith.constant 0 : index
    %7 = vector.load %arg4[%c0_5, %c0_6] : memref<32x128xf32, #tpu.memory_space<vmem>>, vector<32x128xf32>
    tpu.vector_store %arg4[%c0_5, %c0_6], %6 {strides = array<i32>} : memref<32x128xf32, #tpu.memory_space<vmem>>, vector<32x128xf32>,
    return
  }
  func.func @transform_0(%arg0: i32) -> (i32, i32) {
    %c0_i32 = arith.constant 0 : i32
    %c0_i32_0 = arith.constant 0 : i32
    return %arg0, %c0_i32 : i32, i32
  }
  func.func @transform_1(%arg0: i32) -> (i32, i32) {
    %c0_i32 = arith.constant 0 : i32
    %c0_i32_0 = arith.constant 0 : i32
    %c0_i32_1 = arith.constant 0 : i32
    return %c0_i32, %c0_i32_0 : i32, i32
  }
  func.func @transform_2(%arg0: i32) -> (i32, i32) {
    %c0_i32 = arith.constant 0 : i32
    %c0_i32_0 = arith.constant 0 : i32
    %c0_i32_1 = arith.constant 0 : i32
    return %c0_i32, %c0_i32_0 : i32, i32
  }
  func.func @transform_3(%arg0: i32) -> (i32, i32) {
    %c0_i32 = arith.constant 0 : i32
    %c0_i32_0 = arith.constant 0 : i32
    return %c0_i32, %arg0 : i32, i32
  }
}

</mosaic_0001>

<bundles_post_ra>
// kernel: tpu_custom_call.1
= control target key start
LH: loop header
LB: loop body
LE: loop exit
PB: predicated region body
PF: predicated region fallthrough
CT: control target
= control target key end

     0   :  { %vm59_vm0 = vcmask 261120   ;;  %v397_v6 = vmov 0   ;;  %s579_s0 = inlined_call_operand.vmem [shape: f32[128,32], index: 0, kind: input, shape index: {}]   ;;  %s580_s1 = inlined_call_operand.vmem [shape: f32[32,32], index: 1, kind: input, shape index: {}]   ;;  %s581_s2 = inlined_call_operand.vmem [shape: f32[32,1], index: 2, kind: input, shape index: {}]   ;;  %s582_s3 = inlined_call_operand.hbm [shape: f32[32,128], index: 3, kind: output, shape index: {}]  }
   0x1   :  { %v19_v0 = vld [vmem:[%s579_s0] sm:$0xff]  ;;  %v20_v1 = vld [vmem:[%s579_s0 + $0x8] sm:$0xff]  ;;  %v21_v2 = vld [vmem:[%s579_s0 + $0x10] sm:$0xff]  ;;  %372 = vset.pattern.permute.xlu1 %v397_v6  ;;  %371 = vset.pattern.permute.xlu0 %v397_v6 }
   0x2   :  { %v303_v3 = vpack.c.bf16 %v20_v1, %v19_v0  ;;  %vm432_vm1 = vmpackc.low %vm59_vm0, %vm59_vm0  ;;  %v22_v5 = vld [vmem:[%s579_s0 + $0x18] sm:$0xff]  ;;  %v15_v8 = vld [vmem:[%s580_s1] sm:$0xff] }
   0x3   :  { %v309_v7 = vpack.c.bf16 %v22_v5, %v21_v2  ;;  %v23_v9 = vld [vmem:[%s579_s0 + $0x20] sm:$0xff]  ;;  %v24_v10 = vld [vmem:[%s579_s0 + $0x28] sm:$0xff]  ;;  %297 = vmatprep.mubr.msk.f32.mxu0 %vm59_vm0, %v15_v8  ;;  %v17_v11 = vld [vmem:[%s580_s1 + $0x10] sm:$0xff] }
   0x4   :  { %305 = vmatprep.subr.msk.bf16.mxu0 %vm432_vm1, %v303_v3  ;;  %351 = vmatprep.subr.msk.bf16.mxu1 %vm432_vm1, %v303_v3  ;;  %v37_v12 = vld [vmem:[%s581_s2 + $0x10] sm:$0xff]  ;;  %v35_v13 = vld [vmem:[%s581_s2] sm:$0xff] }
   0x5   :  { %308 = vmatpush3.bf16.xpose.msk.msra.mxu0 %vm432_vm1, %v303_v3  ;;  %359 = vmatpush3.bf16.xpose.msk.msra.mxu1 %vm432_vm1, %v303_v3 }
   0x6   :  { %311 = vmatprep.subr.msk.bf16.mxu0 %vm432_vm1, %v309_v7  ;;  %352 = vmatprep.subr.msk.bf16.mxu1 %vm432_vm1, %v309_v7 }
   0x7   :  { %300 = vmatprep.mubr.msk.f32.mxu1 %vm59_vm0, %v17_v11  ;;  %51 = vperm.xlu1 %372, %v37_v12  }
   0x8   :  { %41 = vperm.xlu0 %371, %v35_v13  }
   0x9   :  { %8 = vsyncpa [#allocation3], 0  ;;  %v315_v14 = vpack.c.bf16 %v24_v10, %v23_v9  ;;  %v38_v15 = vld [vmem:[%s581_s2 + $0x18] sm:$0xff]  ;;  %v36_v16 = vld [vmem:[%s581_s2 + $0x8] sm:$0xff]  ;;  %s398_s4 = smov [#allocation2]  }
   0xa   :  { %v25_v17 = vld [vmem:[%s579_s0 + $0x30] sm:$0xff]  ;;  %v26_v18 = vld [vmem:[%s579_s0 + $0x38] sm:$0xff]  ;;  %v27_v20 = vld [vmem:[%s579_s0 + $0x40] sm:$0xff]  ;;  %s214_s5 = sshll.u32 %s398_s4, 4  ;;  %s215_s5 = int_to_ptr.vmem [resolvable:$true] %s214_s5 }
   0xb   :  { %56 = vperm.xlu1 %372, %v38_v15   ;;  %v321_v19 = vpack.c.bf16 %v26_v18, %v25_v17  ;;  %v28_v21 = vld [vmem:[%s579_s0 + $0x48] sm:$0xff]  ;;  %v29_v23 = vld [vmem:[%s579_s0 + $0x50] sm:$0xff]  ;;  %v30_v24 = vld [vmem:[%s579_s0 + $0x58] sm:$0xff]  ;;  %p378_p1 = scmp.lt.s32.totalorder %s215_s5, %s215_s5 }
   0xc   :  { %46 = vperm.xlu0 %371, %v36_v16   ;;  %v327_v22 = vpack.c.bf16 %v28_v21, %v27_v20  ;;  %v333_v25 = vpack.c.bf16 %v30_v24, %v29_v23  ;;  %v31_v26 = vld [vmem:[%s579_s0 + $0x60] sm:$0xff]  ;;  %v32_v27 = vld [vmem:[%s579_s0 + $0x68] sm:$0xff]  ;;  %v33_v29 = vld [vmem:[%s579_s0 + $0x70] sm:$0xff] }
   0xd   :  { %314 = vmatpush3.bf16.xpose.msk.msra.mxu0 %vm432_vm1, %v309_v7  ;;  %360 = vmatpush3.bf16.xpose.msk.msra.mxu1 %vm432_vm1, %v309_v7  ;;  %v339_v28 = vpack.c.bf16 %v32_v27, %v31_v26  ;;  %v34_v30 = vld [vmem:[%s579_s0 + $0x78] sm:$0xff]  ;;  %v16_v32 = vld [vmem:[%s580_s1 + $0x8] sm:$0xff] }
   0xe   :  { %317 = vmatprep.subr.msk.bf16.mxu0 %vm432_vm1, %v315_v14  ;;  %353 = vmatprep.subr.msk.bf16.mxu1 %vm432_vm1, %v315_v14  ;;  %v345_v31 = vpack.c.bf16 %v34_v30, %v33_v29  ;;  %v18_v33 = vld [vmem:[%s580_s1 + $0x18] sm:$0xff]  ;;  %s373_s1 = scalar_lea.vmem %s215_s5, 512 }
   0xf   :  { %p374_p0 = scmp.ne.s32.totalorder %s215_s5, %s373_s1  ;;  %p379_p2 = scmp.lt.s32.totalorder %s373_s1, %s373_s1 }
  0x11   :  { %p380_p3 = por %p379_p2, %p378_p1 }
  0x13   :  { %p381_p4 = pnand %p380_p3, %p374_p0 }
  0x15   :  { %320 = vmatpush3.bf16.xpose.msk.msra.mxu0 %vm432_vm1, %v315_v14  ;;  %361 = vmatpush3.bf16.xpose.msk.msra.mxu1 %vm432_vm1, %v315_v14 }
  0x16   :  { %323 = vmatprep.subr.msk.bf16.mxu0 %vm432_vm1, %v321_v19  ;;  %354 = vmatprep.subr.msk.bf16.mxu1 %vm432_vm1, %v321_v19 }
  0x1d   :  { %326 = vmatpush3.bf16.xpose.msk.msra.mxu0 %vm432_vm1, %v321_v19  ;;  %362 = vmatpush3.bf16.xpose.msk.msra.mxu1 %vm432_vm1, %v321_v19 }
  0x1e   :  { %329 = vmatprep.subr.msk.bf16.mxu0 %vm432_vm1, %v327_v22  ;;  %355 = vmatprep.subr.msk.bf16.mxu1 %vm432_vm1, %v327_v22 }
  0x25   :  { %332 = vmatpush3.bf16.xpose.msk.msra.mxu0 %vm432_vm1, %v327_v22  ;;  %363 = vmatpush3.bf16.xpose.msk.msra.mxu1 %vm432_vm1, %v327_v22 }
  0x26   :  { %335 = vmatprep.subr.msk.bf16.mxu0 %vm432_vm1, %v333_v25  ;;  %356 = vmatprep.subr.msk.bf16.mxu1 %vm432_vm1, %v333_v25 }
  0x2d   :  { %338 = vmatpush3.bf16.xpose.msk.msra.mxu0 %vm432_vm1, %v333_v25  ;;  %364 = vmatpush3.bf16.xpose.msk.msra.mxu1 %vm432_vm1, %v333_v25 }
  0x2e   :  { %341 = vmatprep.subr.msk.bf16.mxu0 %vm432_vm1, %v339_v28  ;;  %357 = vmatprep.subr.msk.bf16.mxu1 %vm432_vm1, %v339_v28 }
  0x35   :  { %344 = vmatpush3.bf16.xpose.msk.msra.mxu0 %vm432_vm1, %v339_v28  ;;  %365 = vmatpush3.bf16.xpose.msk.msra.mxu1 %vm432_vm1, %v339_v28 }
  0x36   :  { %347 = vmatprep.subr.msk.bf16.mxu0 %vm432_vm1, %v345_v31  ;;  %358 = vmatprep.subr.msk.bf16.mxu1 %vm432_vm1, %v345_v31 }
  0x3d   :  { %350 = vmatpush3.bf16.xpose.msk.msra.mxu0 %vm432_vm1, %v345_v31  ;;  %366 = vmatpush3.bf16.xpose.msk.msra.mxu1 %vm432_vm1, %v345_v31 }
  0x44   :  { %298 = vmatmul.mubr.msk.f32.vlgmr.msra.gmra.mrb[0].mxu0 %vm59_vm0, %v16_v32  ;;  %301 = vmatmul.mubr.msk.f32.vlgmr.msra.gmra.mrb[0].mxu1 %vm59_vm0, %v18_v33 }
  0x86   :  { %v52_v34 = vpop.permute.xlu1 %51 }
  0x87   :  { %v42_v35 = vpop.permute.xlu0 %41 }
  0x8a   :  { %v57_v36 = vpop.permute.xlu1 %56 }
  0x8b   :  { %v47_v37 = vpop.permute.xlu0 %46 }
 0x117   :  { %v299_v38 = vpop.f32.mrb[0].mxu0  ;;  %v302_v39 = vpop.f32.mrb[0].mxu1 }
 0x118   :  { %v192_v40 = vadd.f32 %v299_v38, %v47_v37  ;;  %v202_v41 = vadd.f32 %v302_v39, %v57_v36  ;;  %v186_v42 = vpop.f32.mrb[1].mxu0  ;;  %v196_v43 = vpop.f32.mrb[1].mxu1 }
 0x119   :  { %v187_v44 = vadd.f32 %v186_v42, %v42_v35  ;;  %v197_v45 = vadd.f32 %v196_v43, %v52_v34 }
 0x11a   :  { %206 = vst [vmem:[#allocation2 + $0x8] sm:$0xff] %v192_v40  ;;  %208 = vst [vmem:[#allocation2 + $0x18] sm:$0xff] %v202_v41 }
 0x11b   :  { %205 = vst [vmem:[#allocation2] sm:$0xff] %v187_v44  ;;  %207 = vst [vmem:[#allocation2 + $0x10] sm:$0xff] %v197_v45 }
 0x11c   :  { %384 = shalt.err (!%p381_p4)
}
 0x11d   :  { %s385_s8 = scalar_lea.hbm %s582_s3, 512 }
 0x11e   :  { %p386_p5 = scmp.ne.s32.totalorder %s582_s3, %s385_s8  ;;  %p389_p6 = scmp.lt.u32.totalorder %s385_s8, %s582_s3 }
 0x120   :  { %p391_p7 = pnand %p389_p6, %p386_p5 }
 0x122   :  { %394 = shalt.err (!%p391_p7)
}
 0x123   :  { %s399_s2 = smov 128   ;;  %s400_s13 = smov 8  }
 0x124   :  { %220 = dma.vmem_to_hbm [thread:$0]  %s215_s5, 512, %s582_s3, [#allocation3], %s399_s2, %s399_s2, %s400_s13  }
 0x125   :  { %395 = dma.done.wait [#allocation3], 512  }
 0x126   :  { %396 = vsyncadd [#allocation3], 4294966784 }
 0x127   :  { %224 = vsyncpa [#allocation3], 1 }

</bundles_post_ra>
